<compile_context>
chip_gen: v6e
topology: v6e:2x2x1
jax: 0.10.0
libtpu: 0.0.40
codegen_flags: <defaults>
</compile_context>

<pallas_src>
import functools

import numpy as np
import jax
import jax.numpy as jnp
from jax.experimental import pallas as pl
from jax.experimental.pallas import tpu as pltpu

TEMPERATURE = 1.0
BN_EPS = 1e-5


def _full_spec(shape):
    n = len(shape)
    return pl.BlockSpec(shape, lambda i, n=n: (0,) * n)


# --------------------------------------------------------------------------- #
# Kernel 1: attention head.  Input is the already-pooled (B, Cin) tensor.
# --------------------------------------------------------------------------- #
def _attention_kernel(pooled_ref, fc_wt_ref, gamma_ref, beta_ref,
                      heads_wt_ref, heads_b_ref,
                      ch_out_ref, fl_out_ref, kn_out_ref, *, c_in, c_out, k):
    pooled = pooled_ref[...]                                    # (B, Cin)
    y = jnp.dot(pooled, fc_wt_ref[...],
                preferred_element_type=jnp.float32)             # (B, att)
    # BatchNorm2d on a 1x1 spatial map == batch-statistics norm over axis 0
    # (training-mode stats of a freshly-constructed nn.BatchNorm2d).
    mu = jnp.mean(y, axis=0, keepdims=True)
    var = jnp.mean((y - mu) * (y - mu), axis=0, keepdims=True)
    y = (y - mu) * jax.lax.rsqrt(var + BN_EPS)
    y = y * gamma_ref[...] + beta_ref[...]
    y = jnp.maximum(y, 0.0)                                     # ReLU

    inv_t = 1.0 / TEMPERATURE
    # One fused matmul for all three heads: (B, Cin + Cout + K)
    z = (jnp.dot(y, heads_wt_ref[...], preferred_element_type=jnp.float32)
         + heads_b_ref[...]) * inv_t

    ch_out_ref[...] = jax.nn.sigmoid(z[:, :c_in])
    fl_out_ref[...] = jax.nn.sigmoid(z[:, c_in:c_in + c_out])
    kn_out_ref[...] = jax.nn.softmax(z[:, c_in + c_out:c_in + c_out + k],
                                     axis=-1)


def pmdc_attention(pooled, p):
    B, C_in = pooled.shape
    att = p["fc_w"].shape[0]
    C_out = p["fl_w"].shape[0]
    K = p["kn_w"].shape[0]

    fc_wt = p["fc_w"].T                                         # (Cin, att)
    gamma = p["gamma"].reshape(1, att)
    beta = p["beta"].reshape(1, att)
    # Fuse the three 1x1-conv heads into one matmul.
    heads_wt = jnp.concatenate(
        [p["ch_w"].T, p["fl_w"].T, p["kn_w"].T], axis=1)        # (att, Cin+Cout+K)
    heads_b = jnp.concatenate(
        [p["ch_b"], p["fl_b"], p["kn_b"]]).reshape(1, -1)

    kernel = functools.partial(_attention_kernel, c_in=C_in, c_out=C_out, k=K)
    return pl.pallas_call(
        kernel,
        out_shape=(jax.ShapeDtypeStruct((B, C_in), jnp.float32),
                   jax.ShapeDtypeStruct((B, C_out), jnp.float32),
                   jax.ShapeDtypeStruct((B, K), jnp.float32)),
        grid=(1,),
        in_specs=[_full_spec((B, C_in)),
                  _full_spec((C_in, att)),
                  _full_spec((1, att)), _full_spec((1, att)),
                  _full_spec((att, C_in + C_out + K)),
                  _full_spec((1, C_in + C_out + K))],
        out_specs=(_full_spec((B, C_in)),
                   _full_spec((B, C_out)),
                   _full_spec((B, K))),
        compiler_params=pltpu.CompilerParams(dimension_semantics=("arbitrary",)),
    )(pooled, fc_wt, gamma, beta, heads_wt, heads_b)


# --------------------------------------------------------------------------- #
# Kernel 2: per-sample dynamic convolution (grid over batch).
#   Weights are pre-aggregated per sample with channel/filter attention folded
#   in, so the kernel is a pure ks*ks tap loop of MXU matmuls.
# --------------------------------------------------------------------------- #
def _pmdc_conv_kernel(x_ref, w_ref, out_ref, *, ks, stride, dilation,
                      h_out, w_out, c_in, c_out):
    # x_ref  : (1, Hp, Wp, Cin)       padded input for this sample
    # w_ref  : (1, ks*ks, Cin, Cout)  per-sample aggregated, attention-folded
    # out_ref: (1, Ho*Wo, Cout)       lane-dense output slab
    xs = x_ref[0]                                               # (Hp, Wp, Cin)
    w = w_ref[0]                                                # (ks*ks, Cin, Cout)

    acc = jnp.zeros((h_out * w_out, c_out), jnp.float32)
    # TODO(synk): merge the kx taps into a single matmul with contraction
    # ks*Cin to better feed the 128/256-wide MXU when Cin is small.
    for ky in range(ks):
        for kx in range(ks):
            slab = jax.lax.slice(
                xs,
                (ky * dilation, kx * dilation, 0),
                (ky * dilation + (h_out - 1) * stride + 1,
                 kx * dilation + (w_out - 1) * stride + 1,
                 c_in),
                (stride, stride, 1))                            # (Ho, Wo, Cin)
            slab = slab.reshape(h_out * w_out, c_in)
            acc = acc + jnp.dot(slab, w[ky * ks + kx],
                                preferred_element_type=jnp.float32)

    out_ref[0] = acc.astype(out_ref.dtype)


def pmdc_forward(x_nchw, params, *, stride=1, padding=1, dilation=1,
                 compute_dtype=jnp.float32):
    B, C_in, H, W = x_nchw.shape
    K, C_out, _, ks, _ = params["weight"].shape

    x_nhwc = jnp.transpose(x_nchw, (0, 2, 3, 1)).astype(jnp.float32)

    # AdaptiveAvgPool2d(1) in plain XLA (HBM-bandwidth bound) -> (B, Cin).
    pooled = jnp.mean(x_nhwc, axis=(1, 2))
    ch, fl, kn = pmdc_attention(pooled, params)         # (B,Cin),(B,Cout),(B,K)

    # Per-sample aggregated weight with channel & filter attention folded in:
    # (K, Cout, Cin, kh, kw) -> (K, kh*kw, Cin, Cout) -> (B, kh*kw, Cin, Cout)
    w_r = jnp.transpose(params["weight"], (0, 3, 4, 2, 1)).reshape(
        K, ks * ks, C_in, C_out)
    w_eff = jnp.einsum("bk,ktio->btio", kn, w_r)
    w_eff = w_eff * ch[:, None, :, None] * fl[:, None, None, :]
    w_eff = w_eff.astype(compute_dtype)                 # bf16 on v6e/v7x if desired

    x_pad = jnp.pad(
        x_nhwc, ((0, 0), (padding, padding), (padding, padding), (0, 0))
    ).astype(compute_dtype)
    Hp, Wp = H + 2 * padding, W + 2 * padding
    H_out = (H + 2 * padding - dilation * (ks - 1) - 1) // stride + 1
    W_out = (W + 2 * padding - dilation * (ks - 1) - 1) // stride + 1

    kernel = functools.partial(_pmdc_conv_kernel, ks=ks, stride=stride,
                               dilation=dilation, h_out=H_out, w_out=W_out,
                               c_in=C_in, c_out=C_out)

    # Explicit VMEM budget: double-buffered input + weight + output blocks
    # plus headroom for the f32 accumulator / temporaries.
    itemsize = jnp.dtype(compute_dtype).itemsize
    per_step = ((Hp * Wp * C_in + ks * ks * C_in * C_out) * itemsize
                + H_out * W_out * C_out * 4)
    vmem_limit = int(min(max(4 * per_step + (8 << 20), 32 << 20), 96 << 20))

    # TODO(synk): for large spatial extents add an H_out-tile grid axis with a
    # halo input block so both v7x TensorCores stay busy at batch=1 and the
    # per-step VMEM working set shrinks.
    out_flat = pl.pallas_call(
        kernel,
        out_shape=jax.ShapeDtypeStruct((B, H_out * W_out, C_out), jnp.float32),
        grid=(B,),
        in_specs=[pl.BlockSpec((1, Hp, Wp, C_in), lambda b: (b, 0, 0, 0)),
                  pl.BlockSpec((1, ks * ks, C_in, C_out), lambda b: (b, 0, 0, 0))],
        out_specs=pl.BlockSpec((1, H_out * W_out, C_out), lambda b: (b, 0, 0)),
        compiler_params=pltpu.CompilerParams(
            dimension_semantics=("parallel",),
            vmem_limit_bytes=vmem_limit),
    )(x_pad, w_eff)

    out_nhwc = out_flat.reshape(B, H_out, W_out, C_out)
    return jnp.transpose(out_nhwc, (0, 3, 1, 2))                # back to NCHW


# --------------------------------------------------------------------------- #
# Parameters (deterministic, kaiming-style std; biases zero like the module)
# --------------------------------------------------------------------------- #
def init_params(key, in_planes, out_planes, kernel_size, kernel_num,
                reduction=0.0625, min_channel=16):
    att = max(int(in_planes * reduction), min_channel)
    ks = jax.random.split(key, 5)
    p = {
        "fc_w": jax.random.normal(ks[0], (att, in_planes), jnp.float32)
                * np.sqrt(2.0 / att),
        "gamma": jnp.ones((att,), jnp.float32),
        "beta": jnp.zeros((att,), jnp.float32),
        "ch_w": jax.random.normal(ks[1], (in_planes, att), jnp.float32)
                * np.sqrt(2.0 / in_planes),
        "ch_b": jnp.zeros((in_planes,), jnp.float32),
        "fl_w": jax.random.normal(ks[2], (out_planes, att), jnp.float32)
                * np.sqrt(2.0 / out_planes),
        "fl_b": jnp.zeros((out_planes,), jnp.float32),
        "kn_w": jax.random.normal(ks[3], (kernel_num, att), jnp.float32)
                * np.sqrt(2.0 / kernel_num),
        "kn_b": jnp.zeros((kernel_num,), jnp.float32),
        "weight": jax.random.normal(
            ks[4], (kernel_num, out_planes, in_planes, kernel_size, kernel_size),
            jnp.float32) * np.sqrt(2.0 / (out_planes * kernel_size * kernel_size)),
    }
    return p


# --------------------------------------------------------------------------- #
# Pure-JAX reference (for a correctness cross-check)
# --------------------------------------------------------------------------- #
def pmdc_ref(x_nchw, p, stride, padding, dilation):
    B, C_in, H, W = x_nchw.shape
    K, C_out, _, ks, _ = p["weight"].shape
    pooled = jnp.mean(x_nchw, axis=(2, 3))
    y = pooled @ p["fc_w"].T
    mu = jnp.mean(y, axis=0, keepdims=True)
    var = jnp.mean((y - mu) ** 2, axis=0, keepdims=True)
    y = (y - mu) * jax.lax.rsqrt(var + BN_EPS) * p["gamma"] + p["beta"]
    y = jnp.maximum(y, 0.0)
    ch = jax.nn.sigmoid((y @ p["ch_w"].T + p["ch_b"]) / TEMPERATURE)
    fl = jax.nn.sigmoid((y @ p["fl_w"].T + p["fl_b"]) / TEMPERATURE)
    kn = jax.nn.softmax((y @ p["kn_w"].T + p["kn_b"]) / TEMPERATURE, axis=-1)
    xs = x_nchw * ch[:, :, None, None]
    agg = jnp.einsum("bk,kocij->bocij", kn, p["weight"])
    outs = []
    for b in range(B):
        o = jax.lax.conv_general_dilated(
            xs[b:b + 1], agg[b], window_strides=(stride, stride),
            padding=[(padding, padding), (padding, padding)],
            rhs_dilation=(dilation, dilation),
            dimension_numbers=("NCHW", "OIHW", "NCHW"))
        outs.append(o)
    return jnp.concatenate(outs, axis=0) * fl[:, :, None, None]


if __name__ == "__main__":
    B, C_in, C_out, H, W = 2, 4, 8, 16, 16
    ks, K = 3, 4
    stride, padding, dilation = 1, 1, 1

    key = jax.random.PRNGKey(0)
    kx, kp = jax.random.split(key)
    x = jax.random.normal(kx, (B, C_in, H, W), jnp.float32)
    params = init_params(kp, C_in, C_out, ks, K)

    out = pmdc_forward(x, params, stride=stride, padding=padding,
                       dilation=dilation)
    out = jax.block_until_ready(out)

    ref = pmdc_ref(x, params, stride, padding, dilation)
    np.testing.assert_allclose(np.asarray(out), np.asarray(ref),
                               rtol=2e-3, atol=2e-3)
    print("KERNEL_OK")
</pallas_src>

<mosaic_0001>
module attributes {stable_mosaic.version = 11 : i64} {
  func.func @_attention_kernel(%arg0: i32, %arg1: memref<2x4xf32, #tpu.memory_space<vmem>>, %arg2: memref<4x16xf32, #tpu.memory_space<vmem>>, %arg3: memref<1x16xf32, #tpu.memory_space<vmem>>, %arg4: memref<1x16xf32, #tpu.memory_space<vmem>>, %arg5: memref<16x16xf32, #tpu.memory_space<vmem>>, %arg6: memref<1x16xf32, #tpu.memory_space<vmem>>, %arg7: memref<2x4xf32, #tpu.memory_space<vmem>>, %arg8: memref<2x8xf32, #tpu.memory_space<vmem>>, %arg9: memref<2x4xf32, #tpu.memory_space<vmem>>) attributes {dimension_semantics = [#tpu.dimension_semantics<arbitrary>], iteration_bounds = array<i64: 1>, scalar_prefetch = 0 : i64, scratch_operands = 0 : i64, tpu.core_type = #tpu.core_type<tc>, window_params = [{pipeline_mode = #tpu.pipeline_mode<synchronous>, transform_indices = @transform_0, window_bounds = array<i64: 2, 4>}, {pipeline_mode = #tpu.pipeline_mode<synchronous>, transform_indices = @transform_1, window_bounds = array<i64: 4, 16>}, {pipeline_mode = #tpu.pipeline_mode<synchronous>, transform_indices = @transform_2, window_bounds = array<i64: 1, 16>}, {pipeline_mode = #tpu.pipeline_mode<synchronous>, transform_indices = @transform_3, window_bounds = array<i64: 1, 16>}, {pipeline_mode = #tpu.pipeline_mode<synchronous>, transform_indices = @transform_4, window_bounds = array<i64: 16, 16>}, {pipeline_mode = #tpu.pipeline_mode<synchronous>, transform_indices = @transform_5, window_bounds = array<i64: 1, 16>}, {pipeline_mode = #tpu.pipeline_mode<synchronous>, transform_indices = @transform_6, window_bounds = array<i64: 2, 4>}, {pipeline_mode = #tpu.pipeline_mode<synchronous>, transform_indices = @transform_7, window_bounds = array<i64: 2, 8>}, {pipeline_mode = #tpu.pipeline_mode<synchronous>, transform_indices = @transform_8, window_bounds = array<i64: 2, 4>}]} {
    %c0 = arith.constant 0 : index
    %c0_0 = arith.constant 0 : index
    %0 = vector.load %arg1[%c0, %c0_0] : memref<2x4xf32, #tpu.memory_space<vmem>>, vector<2x4xf32>
    %c0_1 = arith.constant 0 : index
    %c0_2 = arith.constant 0 : index
    %1 = vector.load %arg2[%c0_1, %c0_2] : memref<4x16xf32, #tpu.memory_space<vmem>>, vector<4x16xf32>
    %cst = arith.constant dense<0.000000e+00> : vector<2x16xf32>
    %2 = tpu.matmul %0, %1, %cst {dimension_numbers = #tpu.dot_dimension_numbers<[1], [0], [0], [1], [0, 0, 1, 1], [], []>} : vector<2x4xf32>, vector<4x16xf32>, vector<2x16xf32> -> vector<2x16xf32>
    %cst_3 = arith.constant dense<0.000000e+00> : vector<16xf32>
    %3 = vector.multi_reduction <add>, %2, %cst_3 [0] : vector<2x16xf32> to vector<16xf32>
    %4 = vector.shape_cast %3 : vector<16xf32> to vector<1x16xf32>
    %cst_4 = arith.constant 2.000000e+00 : f32
    %5 = vector.broadcast %cst_4 : f32 to vector<1x16xf32>
    %6 = arith.divf %4, %5 : vector<1x16xf32>
    %7 = vector.broadcast %6 : vector<1x16xf32> to vector<2x16xf32>
    %8 = arith.subf %2, %7 : vector<2x16xf32>
    %9 = vector.broadcast %6 : vector<1x16xf32> to vector<2x16xf32>
    %10 = arith.subf %2, %9 : vector<2x16xf32>
    %11 = arith.mulf %8, %10 : vector<2x16xf32>
    %cst_5 = arith.constant dense<0.000000e+00> : vector<16xf32>
    %12 = vector.multi_reduction <add>, %11, %cst_5 [0] : vector<2x16xf32> to vector<16xf32>
    %13 = vector.shape_cast %12 : vector<16xf32> to vector<1x16xf32>
    %cst_6 = arith.constant 2.000000e+00 : f32
    %14 = vector.broadcast %cst_6 : f32 to vector<1x16xf32>
    %15 = arith.divf %13, %14 : vector<1x16xf32>
    %16 = vector.broadcast %6 : vector<1x16xf32> to vector<2x16xf32>
    %17 = arith.subf %2, %16 : vector<2x16xf32>
    %cst_7 = arith.constant 9.99999974E-6 : f32
    %18 = vector.broadcast %cst_7 : f32 to vector<1x16xf32>
    %19 = arith.addf %15, %18 : vector<1x16xf32>
    %20 = math.rsqrt %19 : vector<1x16xf32>
    %21 = vector.broadcast %20 : vector<1x16xf32> to vector<2x16xf32>
    %22 = arith.mulf %17, %21 : vector<2x16xf32>
    %c0_8 = arith.constant 0 : index
    %c0_9 = arith.constant 0 : index
    %23 = vector.load %arg3[%c0_8, %c0_9] : memref<1x16xf32, #tpu.memory_space<vmem>>, vector<1x16xf32>
    %24 = vector.broadcast %23 : vector<1x16xf32> to vector<2x16xf32>
    %25 = arith.mulf %22, %24 : vector<2x16xf32>
    %c0_10 = arith.constant 0 : index
    %c0_11 = arith.constant 0 : index
    %26 = vector.load %arg4[%c0_10, %c0_11] : memref<1x16xf32, #tpu.memory_space<vmem>>, vector<1x16xf32>
    %27 = vector.broadcast %26 : vector<1x16xf32> to vector<2x16xf32>
    %28 = arith.addf %25, %27 : vector<2x16xf32>
    %cst_12 = arith.constant 0.000000e+00 : f32
    %29 = vector.broadcast %cst_12 : f32 to vector<2x16xf32>
    %30 = arith.maximumf %28, %29 : vector<2x16xf32>
    %c0_13 = arith.constant 0 : index
    %c0_14 = arith.constant 0 : index
    %31 = vector.load %arg5[%c0_13, %c0_14] : memref<16x16xf32, #tpu.memory_space<vmem>>, vector<16x16xf32>
    %cst_15 = arith.constant dense<0.000000e+00> : vector<2x16xf32>
    %32 = tpu.matmul %30, %31, %cst_15 {dimension_numbers = #tpu.dot_dimension_numbers<[1], [0], [0], [1], [0, 0, 1, 1], [], []>} : vector<2x16xf32>, vector<16x16xf32>, vector<2x16xf32> -> vector<2x16xf32>
    %c0_16 = arith.constant 0 : index
    %c0_17 = arith.constant 0 : index
    %33 = vector.load %arg6[%c0_16, %c0_17] : memref<1x16xf32, #tpu.memory_space<vmem>>, vector<1x16xf32>
    %34 = vector.broadcast %33 : vector<1x16xf32> to vector<2x16xf32>
    %35 = arith.addf %32, %34 : vector<2x16xf32>
    %cst_18 = arith.constant 1.000000e+00 : f32
    %36 = vector.broadcast %cst_18 : f32 to vector<2x16xf32>
    %37 = arith.mulf %35, %36 : vector<2x16xf32>
    %38 = vector.extract_strided_slice %37 {offsets = [0, 0], sizes = [2, 4], strides = [1, 1]} : vector<2x16xf32> to vector<2x4xf32>
    %39 = arith.negf %38 : vector<2x4xf32>
    %40 = math.exp %39 : vector<2x4xf32>
    %cst_19 = arith.constant 1.000000e+00 : f32
    %41 = vector.broadcast %cst_19 : f32 to vector<2x4xf32>
    %42 = arith.addf %41, %40 : vector<2x4xf32>
    %43 = arith.divf %41, %42 : vector<2x4xf32>
    %c0_20 = arith.constant 0 : index
    %c0_21 = arith.constant 0 : index
    %44 = vector.load %arg7[%c0_20, %c0_21] : memref<2x4xf32, #tpu.memory_space<vmem>>, vector<2x4xf32>
    tpu.vector_store %arg7[%c0_20, %c0_21], %43 {strides = array<i32>} : memref<2x4xf32, #tpu.memory_space<vmem>>, vector<2x4xf32>,
    %45 = vector.extract_strided_slice %37 {offsets = [0, 4], sizes = [2, 8], strides = [1, 1]} : vector<2x16xf32> to vector<2x8xf32>
    %46 = arith.negf %45 : vector<2x8xf32>
    %47 = math.exp %46 : vector<2x8xf32>
    %cst_22 = arith.constant 1.000000e+00 : f32
    %48 = vector.broadcast %cst_22 : f32 to vector<2x8xf32>
    %49 = arith.addf %48, %47 : vector<2x8xf32>
    %50 = arith.divf %48, %49 : vector<2x8xf32>
    %c0_23 = arith.constant 0 : index
    %c0_24 = arith.constant 0 : index
    %51 = vector.load %arg8[%c0_23, %c0_24] : memref<2x8xf32, #tpu.memory_space<vmem>>, vector<2x8xf32>
    tpu.vector_store %arg8[%c0_23, %c0_24], %50 {strides = array<i32>} : memref<2x8xf32, #tpu.memory_space<vmem>>, vector<2x8xf32>,
    %52 = vector.extract_strided_slice %37 {offsets = [0, 12], sizes = [2, 4], strides = [1, 1]} : vector<2x16xf32> to vector<2x4xf32>
    %cst_25 = arith.constant dense<0xFF800000> : vector<2xf32>
    %53 = vector.multi_reduction <maximumf>, %52, %cst_25 [1] : vector<2x4xf32> to vector<2xf32>
    %cst_26 = arith.constant 0xFF800000 : f32
    %54 = vector.broadcast %cst_26 : f32 to vector<2xf32>
    %55 = arith.maximumf %54, %53 : vector<2xf32>
    %56 = vector.shape_cast %55 : vector<2xf32> to vector<2x1xf32>
    %57 = vector.broadcast %56 : vector<2x1xf32> to vector<2x4xf32>
    %58 = arith.subf %52, %57 : vector<2x4xf32>
    %59 = math.exp %58 : vector<2x4xf32>
    %cst_27 = arith.constant dense<0.000000e+00> : vector<2xf32>
    %60 = vector.multi_reduction <add>, %59, %cst_27 [1] : vector<2x4xf32> to vector<2xf32>
    %61 = vector.shape_cast %60 : vector<2xf32> to vector<2x1xf32>
    %62 = vector.broadcast %61 : vector<2x1xf32> to vector<2x4xf32>
    %63 = arith.divf %59, %62 : vector<2x4xf32>
    %c0_28 = arith.constant 0 : index
    %c0_29 = arith.constant 0 : index
    %64 = vector.load %arg9[%c0_28, %c0_29] : memref<2x4xf32, #tpu.memory_space<vmem>>, vector<2x4xf32>
    tpu.vector_store %arg9[%c0_28, %c0_29], %63 {strides = array<i32>} : memref<2x4xf32, #tpu.memory_space<vmem>>, vector<2x4xf32>,
    return
  }
  func.func @transform_0(%arg0: i32) -> (i32, i32) {
    %c0_i32 = arith.constant 0 : i32
    %c0_i32_0 = arith.constant 0 : i32
    %c0_i32_1 = arith.constant 0 : i32
    return %c0_i32, %c0_i32_0 : i32, i32
  }
  func.func @transform_1(%arg0: i32) -> (i32, i32) {
    %c0_i32 = arith.constant 0 : i32
    %c0_i32_0 = arith.constant 0 : i32
    %c0_i32_1 = arith.constant 0 : i32
    return %c0_i32, %c0_i32_0 : i32, i32
  }
  func.func @transform_2(%arg0: i32) -> (i32, i32) {
    %c0_i32 = arith.constant 0 : i32
    %c0_i32_0 = arith.constant 0 : i32
    %c0_i32_1 = arith.constant 0 : i32
    return %c0_i32, %c0_i32_0 : i32, i32
  }
  func.func @transform_3(%arg0: i32) -> (i32, i32) {
    %c0_i32 = arith.constant 0 : i32
    %c0_i32_0 = arith.constant 0 : i32
    %c0_i32_1 = arith.constant 0 : i32
    return %c0_i32, %c0_i32_0 : i32, i32
  }
  func.func @transform_4(%arg0: i32) -> (i32, i32) {
    %c0_i32 = arith.constant 0 : i32
    %c0_i32_0 = arith.constant 0 : i32
    %c0_i32_1 = arith.constant 0 : i32
    return %c0_i32, %c0_i32_0 : i32, i32
  }
  func.func @transform_5(%arg0: i32) -> (i32, i32) {
    %c0_i32 = arith.constant 0 : i32
    %c0_i32_0 = arith.constant 0 : i32
    %c0_i32_1 = arith.constant 0 : i32
    return %c0_i32, %c0_i32_0 : i32, i32
  }
  func.func @transform_6(%arg0: i32) -> (i32, i32) {
    %c0_i32 = arith.constant 0 : i32
    %c0_i32_0 = arith.constant 0 : i32
    %c0_i32_1 = arith.constant 0 : i32
    return %c0_i32, %c0_i32_0 : i32, i32
  }
  func.func @transform_7(%arg0: i32) -> (i32, i32) {
    %c0_i32 = arith.constant 0 : i32
    %c0_i32_0 = arith.constant 0 : i32
    %c0_i32_1 = arith.constant 0 : i32
    return %c0_i32, %c0_i32_0 : i32, i32
  }
  func.func @transform_8(%arg0: i32) -> (i32, i32) {
    %c0_i32 = arith.constant 0 : i32
    %c0_i32_0 = arith.constant 0 : i32
    %c0_i32_1 = arith.constant 0 : i32
    return %c0_i32, %c0_i32_0 : i32, i32
  }
}

</mosaic_0001>

<bundles_post_ra>
// kernel: tpu_custom_call.1
= control target key start
LH: loop header
LB: loop body
LE: loop exit
PB: predicated region body
PF: predicated region fallthrough
CT: control target
= control target key end

     0   :  { %14 = vsyncpa [#allocation3], 0  ;;  %s609_s0 = inlined_call_operand.hbm [shape: f32[2,4], index: 0, kind: input, shape index: {}]   ;;  %s610_s1 = inlined_call_operand.hbm [shape: f32[4,16], index: 1, kind: input, shape index: {}]   ;;  %s611_s2 = inlined_call_operand.vmem [shape: f32[1,16], index: 2, kind: input, shape index: {}]   ;;  %s612_s3 = inlined_call_operand.vmem [shape: f32[1,16], index: 3, kind: input, shape index: {}]   ;;  %s613_s4 = inlined_call_operand.hbm [shape: f32[16,16], index: 4, kind: input, shape index: {}]   ;;  %s614_s5 = inlined_call_operand.vmem [shape: f32[1,16], index: 5, kind: input, shape index: {}]   ;;  %s615_s6 = inlined_call_operand.hbm [shape: f32[2,4], index: 6, kind: output, shape index: {0}]   ;;  %s616_s7 = inlined_call_operand.hbm [shape: f32[2,8], index: 7, kind: output, shape index: {1}]   ;;  %s617_s8 = inlined_call_operand.hbm [shape: f32[2,4], index: 8, kind: output, shape index: {2}]  }
   0x1   :  { %15 = vsyncpa [#allocation6], 0 }
   0x2   :  { %16 = vsyncpa [#allocation4], 0 }
   0x3   :  { %17 = vsyncpa [#allocation10], 0  ;;  %s520_s27 = smov [#allocation5]   ;;  %s521_s29 = smov [#allocation2]  }
   0x4   :  { %s34_s28 = sshll.u32 %s520_s27, 4  ;;  %s24_s30 = sshll.u32 %s521_s29, 4  ;;  %s35_s28 = int_to_ptr.vmem [resolvable:$true] %s34_s28  ;;  %s25_s30 = int_to_ptr.vmem [resolvable:$true] %s24_s30 }
   0x5   :  { %s400_s9 = scalar_lea.vmem %s35_s28, 64  ;;  %p405_p1 = scmp.lt.s32.totalorder %s35_s28, %s35_s28 }
   0x6   :  { %p401_p0 = scmp.ne.s32.totalorder %s35_s28, %s400_s9  ;;  %p406_p2 = scmp.lt.s32.totalorder %s400_s9, %s400_s9 }
   0x8   :  { %p407_p3 = por %p406_p2, %p405_p1 }
   0xa   :  { %p408_p4 = pnand %p407_p3, %p401_p0 }
   0xc   :  { %411 = shalt.err (!%p408_p4)
}
   0xd   :  { %37 = dma.hbm_to_vmem [thread:$0]  %s610_s1, 64, %s35_s28, [#allocation6]  }
   0xe   :  { %s420_s12 = scalar_lea.vmem %s25_s30, 32  ;;  %p425_p6 = scmp.lt.s32.totalorder %s25_s30, %s25_s30 }
   0xf   :  { %p421_p5 = scmp.ne.s32.totalorder %s25_s30, %s420_s12  ;;  %p426_p7 = scmp.lt.s32.totalorder %s420_s12, %s420_s12 }
  0x11   :  { %p427_p8 = por %p426_p7, %p425_p6 }
  0x13   :  { %p428_p9 = pnand %p427_p8, %p421_p5 }
  0x15   :  { %431 = shalt.err (!%p428_p9)
}
  0x16   :  { %27 = dma.hbm_to_vmem [thread:$0]  %s609_s0, 32, %s25_s30, [#allocation3]  }
  0x17   :  { %s522_s15 = smov [#allocation7]  }
  0x18   :  { %s47_s16 = sshll.u32 %s522_s15, 4  ;;  %s48_s16 = int_to_ptr.vmem [resolvable:$true] %s47_s16 }
  0x19   :  { %s440_s17 = scalar_lea.vmem %s48_s16, 256  ;;  %p445_p11 = scmp.lt.s32.totalorder %s48_s16, %s48_s16 }
  0x1a   :  { %p441_p10 = scmp.ne.s32.totalorder %s48_s16, %s440_s17  ;;  %p446_p12 = scmp.lt.s32.totalorder %s440_s17, %s440_s17 }
  0x1c   :  { %p447_p13 = por %p446_p12, %p445_p11 }
  0x1e   :  { %p448_p0 = pnand %p447_p13, %p441_p10 }
  0x20   :  { %451 = shalt.err (!%p448_p0)
}
  0x21   :  { %s523_s1 = smov 128   ;;  %s524_s18 = smov 8  }
  0x22   :  { %53 = dma.hbm_to_vmem [thread:$0]  %s613_s4, 256, %s48_s16, [#allocation6], %s523_s1, %s523_s1, %s524_s18  }
  0x23   :  { %512 = dma.done.wait [#allocation3], 32  }
  0x24   :  { %513 = vsyncadd [#allocation3], 4294967264 }
  0x25   :  { %514 = dma.done.wait [#allocation6], 320  }
  0x26   :  { %515 = vsyncadd [#allocation6], 4294966976  ;;  %v525_v0 = vmov 0.0   ;;  %vm526_vm0 = vmmov 0   ;;  %vm71_vm1 = vcmask 1043456   ;;  %vm67_vm2 = vcmask 31744  }
  0x27   :  { %358 = vmatprep.subr.mxu0 %v525_v0  ;;  %360 = vmatprep.mubr.msk.f32.mxu0 %vm526_vm0, %v525_v0  ;;  %v66_v1 = vld [vmem:[#allocation5] sm:$0xf]  ;;  %v65_v2 = vld [vmem:[#allocation2] sm:$0x3]  ;;  %v186_v3 = vld [vmem:[#allocation7 + $0x8] sm:$0xff]  ;;  %vm145_vm3 = vcmask 123904  }
  0x28   :  { %363 = vmatprep.subr.mxu1 %v525_v0  ;;  %367 = vmatprep.mubr.msk.f32.mxu1 %vm526_vm0, %v525_v0  ;;  %v185_v4 = vld [vmem:[#allocation7] sm:$0xff]  ;;  %v348_v27 = vld [vmem:[%s611_s2] ss:$0 sm:$0xff]  ;;  %vm194_vm4 = vcmask 130048   ;;  %vm282_vm5 = vcmask 124000   ;;  %vm274_vm6 = vcmask 25600  }
  0x29   :  { %359 = vmatpush3.msk.msra.mxu0 %vm71_vm1, %v66_v1  ;;  %364 = vmatpush3.msra.mxu1 %v186_v3  ;;  %v349_v29 = vld [vmem:[%s612_s3] ss:$0 sm:$0xff]  ;;  %s527_s2 = smov 116   ;;  %s528_s3 = smov 124   ;;  %vm280_vm7 = vcmask 58368  }
  0x2a   :  { %361 = vmatmul.mubr.msk.f32.vlgmr.msra.gmra.mxu0 %vm67_vm2, %v65_v2  ;;  %365 = vmatprep.subr.mxu1 %v525_v0  ;;  %v350_v33 = vld [vmem:[%s614_s5] ss:$0 sm:$0xff]  ;;  %s529_s5 = smov [#allocation9]   ;;  %s530_s26 = smov [#allocation8]  }
  0x2b   :  { %366 = vmatpush3.msra.mxu1 %v185_v4  ;;  %s319_s25 = sshll.u32 %s529_s5, 4  ;;  %s309_s27 = sshll.u32 %s530_s26, 4  ;;  %s320_s25 = int_to_ptr.vmem [resolvable:$true] %s319_s25  ;;  %s310_s27 = int_to_ptr.vmem [resolvable:$true] %s309_s27 }
  0x2c   :  { %s452_s28 = scalar_lea.vmem %s310_s27, 32  ;;  %p457_p2 = scmp.lt.s32.totalorder %s310_s27, %s310_s27 }
  0x2d   :  { %p453_p1 = scmp.ne.s32.totalorder %s310_s27, %s452_s28  ;;  %p458_p3 = scmp.lt.s32.totalorder %s452_s28, %s452_s28 }
  0x2f   :  { %p459_p4 = por %p458_p3, %p457_p2 }
  0x31   :  { %p460_p5 = pnand %p459_p4, %p453_p1 }
  0xea   :  { %v141_v5 = vpop.f32.mrf.mxu0 }
  0xeb   :  { %v146_v6 = vsel %vm145_vm3, %v141_v5, 0.0 }
  0xec   :  { %v147_v7 = vrot.slane %v146_v6, 4  ;;  %v362_v8 = vpop.f32.mrf.mxu0 }
  0xee   :  { %v148_v9 = vadd.f32 %v147_v7, %v146_v6 }
  0xf0   :  { %v149_v10 = vrot.slane %v148_v9, 2 }
  0xf2   :  { %v150_v11 = vadd.f32 %v149_v10, %v148_v9 }
  0xf4   :  { %v151_v12 = vrot.slane %v150_v11, 1 }
  0xf6   :  { %v152_v13 = vadd.f32 %v151_v12, %v150_v11 }
  0xf8   :  { %v154_v14 = vmul.f32 0.5, %v152_v13 }
  0xfa   :  { %v155_v15 = vsub.f32 %v141_v5, %v154_v14 }
  0xfc   :  { %v156_v16 = vmul.f32 %v155_v15, %v155_v15 }
  0xfe   :  { %v157_v17 = vsel %vm145_vm3, %v156_v16, 0.0 }
  0xff   :  { %v158_v18 = vrot.slane %v157_v17, 4 }
 0x101   :  { %v159_v19 = vadd.f32 %v158_v18, %v157_v17 }
 0x103   :  { %v160_v20 = vrot.slane %v159_v19, 2 }
 0x105   :  { %v161_v21 = vadd.f32 %v160_v20, %v159_v19 }
 0x107   :  { %v162_v22 = vrot.slane %v161_v21, 1 }
 0x109   :  { %v163_v23 = vadd.f32 %v162_v22, %v161_v21 }
 0x10b   :  { %v164_v24 = vmul.f32 0.5, %v163_v23 }
 0x10d   :  { %v165_v25 = vadd.f32 1e-05, %v164_v24 }
 0x10f   :  { %382 = vrsqrt.f32 %v165_v25 }
 0x11c   :  { %v383_v26 = vpop.eup %382 }
 0x11d   :  { %v167_v28 = vmul.f32 %v383_v26, %v155_v15 }
 0x11f   :  { %v175_v30 = vmul.f32 %v348_v27, %v167_v28 }
 0x121   :  { %v183_v31 = vadd.f32 %v349_v29, %v175_v30 }
 0x123   :  { %v184_v32 = vmax.f32 %v183_v31, 0.0 }
 0x125   :  { %368 = vmatmul.mubr.msk.f32.vlgmr.msra.gmra.mxu1 %vm194_vm4, %v184_v32 }
 0x1e5   :  { %v264_v34 = vpop.f32.mrf.mxu1 }
 0x1e6   :  { %v265_v35 = vadd.f32 %v350_v33, %v264_v34 }
 0x1e7   :  { %v369_v36 = vpop.f32.mrf.mxu1 }
 0x1e8   :  { %v352_v37 = vmul.f32 -1.442695, %v265_v35  ;;  %v283_v38 = vsel %vm282_vm5, %v265_v35, -inf }
 0x1e9   :  { %284 = vmax.xlane.f32.xlu0 %v283_v38 }
 0x1ea   :  { %384 = vpow2.f32 %v352_v37 }
 0x1f7   :  { %v385_v39 = vpop.eup %384 }
 0x1f8   :  { %v271_v40 = vadd.f32 1.0, %v385_v39 }
 0x1fa   :  { %386 = vrcp.f32 %v271_v40 }
 0x207   :  { %v387_v41 = vpop.eup %386 }
 0x208   :  { %275 = vst.msk [vmem:[#allocation8] sm:$0x3] %vm274_vm6, %v387_v41 }
 0x272   :  { %v285_v42 = vpop.xlane.xlu0 %284 }
 0x273   :  { %v286_v43 = vsub.f32 %v265_v35, %v285_v42 }
 0x275   :  { %v287_v44 = vmul.f32 1.442695, %v286_v43 }
 0x277   :  { %388 = vpow2.f32 %v287_v44 }
 0x284   :  { %v389_v45 = vpop.eup %388 }
 0x285   :  { %290 = vrot.lane.b32.xlu0 %v389_v45, %s527_s2 }
 0x2f7   :  { %v291_v46 = vpop.permute.xlu0 %290 }
 0x2f8   :  { %v293_v47 = vsel %vm274_vm6, %v291_v46, 0.0 }
 0x2f9   :  { %294 = vadd.xlane.f32.xlu1 %v293_v47 }
 0x30a   :  { %277 = vrot.lane.b32.xlu1 %v387_v41, %s528_s3 }
 0x382   :  { %v295_v48 = vpop.xlane.xlu1 %294 }
 0x383   :  { %390 = vrcp.f32 %v295_v48 }
 0x386   :  { %v278_v49 = vpop.permute.xlu1 %277 }
 0x387   :  { %281 = vst.msk [vmem:[#allocation9] sm:$0x3] %vm280_vm7, %v278_v49 }
 0x388   :  { %463 = shalt.err (!%p460_p5)
}
 0x389   :  { %312 = dma.vmem_to_hbm [thread:$0]  %s310_s27, 32, %s615_s6, [#allocation4]  }
 0x38a   :  { %s472_s9 = scalar_lea.vmem %s320_s25, 32  ;;  %p477_p7 = scmp.lt.s32.totalorder %s320_s25, %s320_s25 }
 0x38b   :  { %p473_p6 = scmp.ne.s32.totalorder %s320_s25, %s472_s9  ;;  %p478_p8 = scmp.lt.s32.totalorder %s472_s9, %s472_s9 }
 0x38d   :  { %p479_p9 = por %p478_p8, %p477_p7 }
 0x38f   :  { %p480_p10 = pnand %p479_p9, %p473_p6 }
 0x391   :  { %483 = shalt.err (!%p480_p10)
}
 0x392   :  { %322 = dma.vmem_to_hbm [thread:$0]  %s320_s25, 32, %s616_s7, [#allocation10]   ;;  %v391_v50 = vpop.eup %390 }
 0x393   :  { %v297_v51 = vmul.f32 %v391_v50, %v389_v45  ;;  %s531_s12 = smov [#allocation11]  }
 0x394   :  { %s329_s13 = sshll.u32 %s531_s12, 4  ;;  %s330_s13 = int_to_ptr.vmem [resolvable:$true] %s329_s13 }
 0x395   :  { %299 = vrot.lane.b32.xlu1 %v297_v51, %s527_s2  ;;  %s492_s6 = scalar_lea.vmem %s330_s13, 32  ;;  %p497_p12 = scmp.lt.s32.totalorder %s330_s13, %s330_s13 }
 0x396   :  { %p493_p11 = scmp.ne.s32.totalorder %s330_s13, %s492_s6  ;;  %p498_p13 = scmp.lt.s32.totalorder %s492_s6, %s492_s6 }
 0x398   :  { %p499_p0 = por %p498_p13, %p497_p12 }
 0x39a   :  { %p500_p1 = pnand %p499_p0, %p493_p11 }
 0x407   :  { %v300_v52 = vpop.permute.xlu1 %299 }
 0x408   :  { %302 = vst.msk [vmem:[#allocation11] sm:$0x3] %vm274_vm6, %v300_v52 }
 0x409   :  { %503 = shalt.err (!%p500_p1)
}
 0x40a   :  { %332 = dma.vmem_to_hbm [thread:$0]  %s330_s13, 32, %s617_s8, [#allocation10]  }
 0x40b   :  { %516 = dma.done.wait [#allocation4], 32  }
 0x40c   :  { %517 = vsyncadd [#allocation4], 4294967264 }
 0x40d   :  { %518 = dma.done.wait [#allocation10], 64  }
 0x40e   :  { %519 = vsyncadd [#allocation10], 4294967232 }
 0x40f   :  { %342 = vsyncpa [#allocation3], 1 }
 0x410   :  { %343 = vsyncpa [#allocation6], 1 }
 0x411   :  { %344 = vsyncpa [#allocation4], 1 }
 0x412   :  { %345 = vsyncpa [#allocation10], 1 }

</bundles_post_ra>
